<compile_context>
chip_gen: v5e
topology: v5e:2x2
jax: 0.10.0
libtpu: 0.0.40
codegen_flags: <defaults>
</compile_context>

<pallas_src>
import functools
import random

import jax
import jax.numpy as jnp
from jax.experimental import pallas as pl
from jax.experimental.pallas import tpu as pltpu

# Deterministic stand-in for the module's `(random.random() > 0.5) * 2 - 1`,
# which PyTorch draws once at construction time.
random.seed(0)
SHIFT = (random.random() > 0.5) * 2 - 1  # -> +1 deterministically

C_IN = 128   # implied by weight shape [32, 3, 128]
C_OUT = 32
K = 3


def _conv_kernel(x_ref, w_ref, col_ref, o_ref, ysc_ref, *, width, shift, b_blk, pad):
    # x_ref:   (B, C_IN, M)       B images: channels (sublanes) x H*W (lanes)
    # w_ref:   (K*C_OUT, C_IN)    stacked weight, row index = k*C_OUT + j
    # col_ref: (1, M) int32       w-coordinate of every flattened position
    # o_ref:   (B, C_OUT, M)
    # ysc_ref: (K*C_OUT, M+2*pad) VMEM scratch: Y at lane offset `pad` plus a
    #                             (width+2)-wide wrap copy -> all "rolls"
    #                             become non-wrapping static slices.
    M = x_ref.shape[-1]
    wrap = width + 2

    # Boundary masks, computed once per grid step at (C_OUT, M) (4x smaller
    # than the old (C_IN, M) broadcast).
    col = jnp.broadcast_to(col_ref[...], (C_OUT, M))
    first = col == 0                         # w == 0
    last = col == width - 1                  # w == W-1
    if shift == 1:
        second = col == 1                    # w == 1
    else:
        penult = col == width - 2            # w == W-2
    zero = jnp.zeros((C_OUT, M), jnp.float32)
    w_all = w_ref[...]                       # (96, 128)

    def rd(k, r):
        # == roll(z_k, r) along the flat spatial axis (z_k = W[:,k,:] @ x);
        # the padded scratch removes any mod-M lane wraparound.
        s0 = pad - r
        return ysc_ref[k * C_OUT:(k + 1) * C_OUT, s0:s0 + M]

    for b in range(b_blk):
        # One MXU dot per image, fed directly from the raw input block.
        y_all = jnp.dot(w_all, x_ref[b], preferred_element_type=jnp.float32)  # (96, M)

        ysc_ref[:, pad:pad + M] = y_all                      # lane-aligned store
        if shift == 1:
            # left wrap region = last (W+2) columns of Y (input row H-1)
            ysc_ref[:, pad - wrap:pad] = y_all[:, M - wrap:]
        else:
            # right wrap region = first (W+2) columns of Y (input row 0)
            ysc_ref[:, pad + M:pad + M + wrap] = y_all[:, :wrap]

        # Per-tap outputs: global flat shift by (s*W + s - d), with the
        # per-row w-wrap fixed at one boundary column and zero padding masks.
        if shift == 1:
            t0 = jnp.where(first, zero,
                           jnp.where(second, rd(0, 2), rd(0, width + 2)))
            t1 = jnp.where(first, rd(1, 1), rd(1, width + 1))
            t2 = jnp.where(last, zero, rd(2, width))
        else:  # shift == -1
            t0 = jnp.where(first, zero, rd(0, -width))
            t1 = jnp.where(last, rd(1, -1), rd(1, -(width + 1)))
            t2 = jnp.where(last, zero,
                           jnp.where(penult, rd(2, -2), rd(2, -(width + 2))))

        o_ref[b] = (t0 + t1 + t2).astype(o_ref.dtype)        # lane-dense store


@functools.partial(jax.jit, static_argnames=("shift",))
def kernel_generated_0_forward(x, w, shift=SHIFT):
    """x: (N, C_IN, H, W) NCHW f32;  w: (C_OUT, K, C_IN);  returns (N, C_OUT, H, W)."""
    N, C, H, Wd = x.shape
    assert C == C_IN and w.shape == (C_OUT, K, C_IN)
    assert shift in (1, -1)
    M = H * Wd
    b_blk = 2 if N % 2 == 0 else 1               # small per-step batching
    pad = ((Wd + 2 + 127) // 128) * 128          # lane-aligned Y placement

    x_flat = x.reshape(N, C, M)                               # free reshape
    w_all = jnp.transpose(w, (1, 0, 2)).reshape(K * C_OUT, C)  # row = k*32+j
    col = (jnp.arange(M, dtype=jnp.int32) % Wd).reshape(1, M)

    kern = functools.partial(_conv_kernel, width=Wd, shift=shift,
                             b_blk=b_blk, pad=pad)
    out_flat = pl.pallas_call(
        kern,
        out_shape=jax.ShapeDtypeStruct((N, C_OUT, M), x.dtype),
        grid_spec=pltpu.PrefetchScalarGridSpec(
            num_scalar_prefetch=0,
            grid=(N // b_blk,),
            in_specs=[
                pl.BlockSpec((b_blk, C, M), lambda n: (n, 0, 0)),
                pl.BlockSpec((K * C_OUT, C), lambda n: (0, 0)),
                pl.BlockSpec((1, M), lambda n: (0, 0)),
            ],
            out_specs=pl.BlockSpec((b_blk, C_OUT, M), lambda n: (n, 0, 0)),
            scratch_shapes=[pltpu.VMEM((K * C_OUT, M + 2 * pad), jnp.float32)],
        ),
        compiler_params=pltpu.CompilerParams(
            dimension_semantics=("parallel",),      # shardable across v7x TCs
            vmem_limit_bytes=32 * 1024 * 1024),     # conservative for v7x
    )(x_flat, w_all, col)
    return out_flat.reshape(N, C_OUT, H, Wd)


def reference_forward(x, w, shift):
    """Pure-JAX reference of the PyTorch module semantics."""
    Wd = x.shape[3]
    xr = jnp.roll(x, shift, axis=3)
    xp = jnp.pad(xr, ((0, 0), (0, 0), (0, 0), (1, 1)))
    taps = jnp.stack([xp[:, :, :, k:k + Wd] for k in range(K)], axis=0)  # (K,N,C,H,W)
    y = jnp.einsum('jkc,knchw->njhw', w, taps,
                   precision=jax.lax.Precision.HIGHEST)
    return jnp.roll(y, shift, axis=2)


if __name__ == "__main__":
    key = jax.random.PRNGKey(0)
    kx, kw = jax.random.split(key)
    w = jax.random.normal(kw, (C_OUT, K, C_IN), dtype=jnp.float32)

    # Channel counts fixed by the weight shape (128 -> 32, kernel 3); batch /
    # spatial scaled down from the hard-coded (128, 128, 56, 56).  The first
    # config has M = 196 (NOT a lane multiple) to exercise the ragged-lane
    # path flagged in the review; the third covers b_blk = 1 and aligned M.
    cases = [(2, 14, 14, 1), (2, 14, 14, -1), (3, 16, 16, 1)]
    for (N, H, Wd, s) in cases:
        x = jax.random.normal(kx, (N, C_IN, H, Wd), dtype=jnp.float32)
        y = jax.block_until_ready(kernel_generated_0_forward(x, w, shift=s))
        y_ref = reference_forward(x, w, s)
        assert y.shape == (N, C_OUT, H, Wd)
        err = float(jnp.max(jnp.abs(y - y_ref)))
        if not bool(jnp.allclose(y, y_ref, atol=1e-3, rtol=1e-3)):
            raise AssertionError(f"mismatch N={N} H={H} W={Wd} shift={s} err={err}")
    print("KERNEL_OK")
</pallas_src>

<mosaic_0001>
module attributes {stable_mosaic.version = 11 : i64} {
  func.func @_conv_kernel(%arg0: i32, %arg1: memref<2x128x196xf32, #tpu.memory_space<vmem>>, %arg2: memref<96x128xf32, #tpu.memory_space<vmem>>, %arg3: memref<1x196xi32, #tpu.memory_space<vmem>>, %arg4: memref<2x32x196xf32, #tpu.memory_space<vmem>>, %arg5: memref<96x452xf32, #tpu.memory_space<vmem>>) attributes {dimension_semantics = [#tpu.dimension_semantics<parallel>], iteration_bounds = array<i64: 1>, scalar_prefetch = 0 : i64, scratch_operands = 1 : i64, tpu.core_type = #tpu.core_type<tc>, window_params = [{transform_indices = @transform_0, window_bounds = array<i64: 2, 128, 196>}, {pipeline_mode = #tpu.pipeline_mode<synchronous>, transform_indices = @transform_1, window_bounds = array<i64: 96, 128>}, {pipeline_mode = #tpu.pipeline_mode<synchronous>, transform_indices = @transform_2, window_bounds = array<i64: 1, 196>}, {transform_indices = @transform_3, window_bounds = array<i64: 2, 32, 196>}]} {
    %c0 = arith.constant 0 : index
    %c0_0 = arith.constant 0 : index
    %0 = vector.load %arg3[%c0, %c0_0] : memref<1x196xi32, #tpu.memory_space<vmem>>, vector<1x196xi32>
    %1 = vector.shape_cast %0 : vector<1x196xi32> to vector<1x196xi32>
    %2 = vector.broadcast %1 : vector<1x196xi32> to vector<32x196xi32>
    %c0_i32 = arith.constant 0 : i32
    %3 = vector.broadcast %c0_i32 : i32 to vector<32x196xi32>
    %4 = arith.cmpi eq, %2, %3 : vector<32x196xi32>
    %c13_i32 = arith.constant 13 : i32
    %5 = vector.broadcast %c13_i32 : i32 to vector<32x196xi32>
    %6 = arith.cmpi eq, %2, %5 : vector<32x196xi32>
    %c1_i32 = arith.constant 1 : i32
    %7 = vector.broadcast %c1_i32 : i32 to vector<32x196xi32>
    %8 = arith.cmpi eq, %2, %7 : vector<32x196xi32>
    %cst = arith.constant 0.000000e+00 : f32
    %9 = vector.broadcast %cst : f32 to vector<32x196xf32>
    %c0_1 = arith.constant 0 : index
    %c0_2 = arith.constant 0 : index
    %10 = vector.load %arg2[%c0_1, %c0_2] : memref<96x128xf32, #tpu.memory_space<vmem>>, vector<96x128xf32>
    %c0_3 = arith.constant 0 : index
    %c0_4 = arith.constant 0 : index
    %c0_5 = arith.constant 0 : index
    %11 = vector.load %arg1[%c0_3, %c0_4, %c0_5] : memref<2x128x196xf32, #tpu.memory_space<vmem>>, vector<1x128x196xf32>
    %12 = vector.shape_cast %11 : vector<1x128x196xf32> to vector<128x196xf32>
    %cst_6 = arith.constant dense<0.000000e+00> : vector<96x196xf32>
    %13 = tpu.matmul %10, %12, %cst_6 {dimension_numbers = #tpu.dot_dimension_numbers<[1], [0], [0], [1], [0, 0, 1, 1], [], []>} : vector<96x128xf32>, vector<128x196xf32>, vector<96x196xf32> -> vector<96x196xf32>
    %c0_7 = arith.constant 0 : index
    %c128 = arith.constant 128 : index
    %14 = vector.load %arg5[%c0_7, %c128] : memref<96x452xf32, #tpu.memory_space<vmem>>, vector<96x196xf32>
    tpu.vector_store %arg5[%c0_7, %c128], %13 {strides = array<i32>} : memref<96x452xf32, #tpu.memory_space<vmem>>, vector<96x196xf32>,
    %15 = vector.extract_strided_slice %13 {offsets = [0, 180], sizes = [96, 16], strides = [1, 1]} : vector<96x196xf32> to vector<96x16xf32>
    %c0_8 = arith.constant 0 : index
    %c112 = arith.constant 112 : index
    %16 = vector.load %arg5[%c0_8, %c112] : memref<96x452xf32, #tpu.memory_space<vmem>>, vector<96x16xf32>
    tpu.vector_store %arg5[%c0_8, %c112], %15 {strides = array<i32>} : memref<96x452xf32, #tpu.memory_space<vmem>>, vector<96x16xf32>,
    %c0_9 = arith.constant 0 : index
    %c126 = arith.constant 126 : index
    %17 = vector.load %arg5[%c0_9, %c126] : memref<96x452xf32, #tpu.memory_space<vmem>>, vector<32x196xf32>
    %c0_10 = arith.constant 0 : index
    %c112_11 = arith.constant 112 : index
    %18 = vector.load %arg5[%c0_10, %c112_11] : memref<96x452xf32, #tpu.memory_space<vmem>>, vector<32x196xf32>
    %19 = arith.select %8, %17, %18 : vector<32x196xi1>, vector<32x196xf32>
    %20 = arith.select %4, %9, %19 : vector<32x196xi1>, vector<32x196xf32>
    %c32 = arith.constant 32 : index
    %c127 = arith.constant 127 : index
    %21 = vector.load %arg5[%c32, %c127] : memref<96x452xf32, #tpu.memory_space<vmem>>, vector<32x196xf32>
    %c32_12 = arith.constant 32 : index
    %c113 = arith.constant 113 : index
    %22 = vector.load %arg5[%c32_12, %c113] : memref<96x452xf32, #tpu.memory_space<vmem>>, vector<32x196xf32>
    %23 = arith.select %4, %21, %22 : vector<32x196xi1>, vector<32x196xf32>
    %c64 = arith.constant 64 : index
    %c114 = arith.constant 114 : index
    %24 = vector.load %arg5[%c64, %c114] : memref<96x452xf32, #tpu.memory_space<vmem>>, vector<32x196xf32>
    %25 = arith.select %6, %9, %24 : vector<32x196xi1>, vector<32x196xf32>
    %26 = arith.addf %20, %23 : vector<32x196xf32>
    %27 = arith.addf %26, %25 : vector<32x196xf32>
    %c0_13 = arith.constant 0 : index
    %c0_14 = arith.constant 0 : index
    %c0_15 = arith.constant 0 : index
    %28 = vector.load %arg4[%c0_13, %c0_14, %c0_15] : memref<2x32x196xf32, #tpu.memory_space<vmem>>, vector<1x32x196xf32>
    %29 = vector.shape_cast %28 : vector<1x32x196xf32> to vector<32x196xf32>
    %30 = vector.shape_cast %27 : vector<32x196xf32> to vector<1x32x196xf32>
    tpu.vector_store %arg4[%c0_13, %c0_14, %c0_15], %30 {strides = array<i32>} : memref<2x32x196xf32, #tpu.memory_space<vmem>>, vector<1x32x196xf32>,
    %c1 = arith.constant 1 : index
    %c0_16 = arith.constant 0 : index
    %c0_17 = arith.constant 0 : index
    %31 = vector.load %arg1[%c1, %c0_16, %c0_17] : memref<2x128x196xf32, #tpu.memory_space<vmem>>, vector<1x128x196xf32>
    %32 = vector.shape_cast %31 : vector<1x128x196xf32> to vector<128x196xf32>
    %cst_18 = arith.constant dense<0.000000e+00> : vector<96x196xf32>
    %33 = tpu.matmul %10, %32, %cst_18 {dimension_numbers = #tpu.dot_dimension_numbers<[1], [0], [0], [1], [0, 0, 1, 1], [], []>} : vector<96x128xf32>, vector<128x196xf32>, vector<96x196xf32> -> vector<96x196xf32>
    %c0_19 = arith.constant 0 : index
    %c128_20 = arith.constant 128 : index
    %34 = vector.load %arg5[%c0_19, %c128_20] : memref<96x452xf32, #tpu.memory_space<vmem>>, vector<96x196xf32>
    tpu.vector_store %arg5[%c0_19, %c128_20], %33 {strides = array<i32>} : memref<96x452xf32, #tpu.memory_space<vmem>>, vector<96x196xf32>,
    %35 = vector.extract_strided_slice %33 {offsets = [0, 180], sizes = [96, 16], strides = [1, 1]} : vector<96x196xf32> to vector<96x16xf32>
    %c0_21 = arith.constant 0 : index
    %c112_22 = arith.constant 112 : index
    %36 = vector.load %arg5[%c0_21, %c112_22] : memref<96x452xf32, #tpu.memory_space<vmem>>, vector<96x16xf32>
    tpu.vector_store %arg5[%c0_21, %c112_22], %35 {strides = array<i32>} : memref<96x452xf32, #tpu.memory_space<vmem>>, vector<96x16xf32>,
    %c0_23 = arith.constant 0 : index
    %c126_24 = arith.constant 126 : index
    %37 = vector.load %arg5[%c0_23, %c126_24] : memref<96x452xf32, #tpu.memory_space<vmem>>, vector<32x196xf32>
    %c0_25 = arith.constant 0 : index
    %c112_26 = arith.constant 112 : index
    %38 = vector.load %arg5[%c0_25, %c112_26] : memref<96x452xf32, #tpu.memory_space<vmem>>, vector<32x196xf32>
    %39 = arith.select %8, %37, %38 : vector<32x196xi1>, vector<32x196xf32>
    %40 = arith.select %4, %9, %39 : vector<32x196xi1>, vector<32x196xf32>
    %c32_27 = arith.constant 32 : index
    %c127_28 = arith.constant 127 : index
    %41 = vector.load %arg5[%c32_27, %c127_28] : memref<96x452xf32, #tpu.memory_space<vmem>>, vector<32x196xf32>
    %c32_29 = arith.constant 32 : index
    %c113_30 = arith.constant 113 : index
    %42 = vector.load %arg5[%c32_29, %c113_30] : memref<96x452xf32, #tpu.memory_space<vmem>>, vector<32x196xf32>
    %43 = arith.select %4, %41, %42 : vector<32x196xi1>, vector<32x196xf32>
    %c64_31 = arith.constant 64 : index
    %c114_32 = arith.constant 114 : index
    %44 = vector.load %arg5[%c64_31, %c114_32] : memref<96x452xf32, #tpu.memory_space<vmem>>, vector<32x196xf32>
    %45 = arith.select %6, %9, %44 : vector<32x196xi1>, vector<32x196xf32>
    %46 = arith.addf %40, %43 : vector<32x196xf32>
    %47 = arith.addf %46, %45 : vector<32x196xf32>
    %c1_33 = arith.constant 1 : index
    %c0_34 = arith.constant 0 : index
    %c0_35 = arith.constant 0 : index
    %48 = vector.load %arg4[%c1_33, %c0_34, %c0_35] : memref<2x32x196xf32, #tpu.memory_space<vmem>>, vector<1x32x196xf32>
    %49 = vector.shape_cast %48 : vector<1x32x196xf32> to vector<32x196xf32>
    %50 = vector.shape_cast %47 : vector<32x196xf32> to vector<1x32x196xf32>
    tpu.vector_store %arg4[%c1_33, %c0_34, %c0_35], %50 {strides = array<i32>} : memref<2x32x196xf32, #tpu.memory_space<vmem>>, vector<1x32x196xf32>,
    return
  }
  func.func @transform_0(%arg0: i32) -> (i32, i32, i32) {
    %c0_i32 = arith.constant 0 : i32
    %c0_i32_0 = arith.constant 0 : i32
    %c0_i32_1 = arith.constant 0 : i32
    return %arg0, %c0_i32, %c0_i32_0 : i32, i32, i32
  }
  func.func @transform_1(%arg0: i32) -> (i32, i32) {
    %c0_i32 = arith.constant 0 : i32
    %c0_i32_0 = arith.constant 0 : i32
    %c0_i32_1 = arith.constant 0 : i32
    return %c0_i32, %c0_i32_0 : i32, i32
  }
  func.func @transform_2(%arg0: i32) -> (i32, i32) {
    %c0_i32 = arith.constant 0 : i32
    %c0_i32_0 = arith.constant 0 : i32
    %c0_i32_1 = arith.constant 0 : i32
    return %c0_i32, %c0_i32_0 : i32, i32
  }
  func.func @transform_3(%arg0: i32) -> (i32, i32, i32) {
    %c0_i32 = arith.constant 0 : i32
    %c0_i32_0 = arith.constant 0 : i32
    %c0_i32_1 = arith.constant 0 : i32
    return %arg0, %c0_i32, %c0_i32_0 : i32, i32, i32
  }
}

</mosaic_0001>

<bundles_post_ra>
// kernel: kernel_generated_0_forward.1
= control target key start
LH: loop header
LB: loop body
LE: loop exit
PB: predicated region body
PF: predicated region fallthrough
CT: control target
= control target key end

     0   :  { %vm174_vm0 = vcmask 556032   ;;  %s1194_s24 = smov 60   ;;  %s1195_s25 = smov 2   ;;  %vm246_vm1 = vcmask 1048448   ;;  %vm307_vm2 = vcmask 15360   ;;  %vm348_vm3 = vcmask 130048   ;;  %s2264_s0 = inlined_call_operand.vmem [shape: f32[2,128,196], index: 0, kind: input, shape index: {}]   ;;  %s2265_s1 = inlined_call_operand.vmem [shape: f32[96,128], index: 1, kind: input, shape index: {}]   ;;  %s2266_s2 = inlined_call_operand.vmem [shape: s32[1,196], index: 2, kind: input, shape index: {}]   ;;  %s2267_s3 = inlined_call_operand.vmem [shape: f32[2,32,196], index: 3, kind: output, shape index: {}]  }
   0x1   :  { %v65_v0 = vld [vmem:[%s2264_s0 + $0xf0] sm:$0xff]  ;;  %v66_v1 = vld [vmem:[%s2264_s0 + $0xf8] sm:$0xff]  ;;  %v63_v2 = vld [vmem:[%s2264_s0 + $0xe0] sm:$0xff]  ;;  %s1196_s26 = smov 16   ;;  %s1197_s5 = smov 1   ;;  %vm429_vm5 = vcmask 7168  }
   0x2   :  { %67 = vmatpush.msra.mxu0 %v65_v0  ;;  %120 = vmatpush.msra.mxu1 %v66_v1  ;;  %v64_v3 = vld [vmem:[%s2264_s0 + $0xe8] sm:$0xff]  ;;  %v1179_v4 = vld [vmem:[%s2264_s0 + $0x1f8] sm:$0xff]  ;;  %v61_v5 = vld [vmem:[%s2264_s0 + $0xd0] sm:$0xff]  ;;  %s1199_s6 = smov 14   ;;  %vm470_vm6 = vcmask 121856   ;;  %vm543_vm9 = vcmask 113664  }
   0x3   :  { %678 = vmatpush.msra.mxu3 %v1179_v4  ;;  %v62_v6 = vld [vmem:[%s2264_s0 + $0xd8] sm:$0xff]  ;;  %v1177_v7 = vld [vmem:[%s2264_s0 + $0x1e8] sm:$0xff]  ;;  %v59_v9 = vld [vmem:[%s2264_s0 + $0xc0] sm:$0xff] }
   0x4   :  { %68 = vmatpush.msra.mxu0 %v63_v2  ;;  %121 = vmatpush.msra.mxu1 %v64_v3  ;;  %v1175_v8 = vld [vmem:[%s2264_s0 + $0x1d8] sm:$0xff]  ;;  %v60_v10 = vld [vmem:[%s2264_s0 + $0xc8] sm:$0xff]  ;;  %v57_v12 = vld [vmem:[%s2264_s0 + $0xb0] sm:$0xff] }
   0x5   :  { %679 = vmatpush.msra.mxu3 %v1177_v7  ;;  %v1173_v11 = vld [vmem:[%s2264_s0 + $0x1c8] sm:$0xff]  ;;  %v58_v13 = vld [vmem:[%s2264_s0 + $0xb8] sm:$0xff]  ;;  %v55_v15 = vld [vmem:[%s2264_s0 + $0xa0] sm:$0xff] }
   0x6   :  { %69 = vmatpush.msra.mxu0 %v61_v5  ;;  %122 = vmatpush.msra.mxu1 %v62_v6  ;;  %v1171_v14 = vld [vmem:[%s2264_s0 + $0x1b8] sm:$0xff]  ;;  %v56_v16 = vld [vmem:[%s2264_s0 + $0xa8] sm:$0xff]  ;;  %v53_v18 = vld [vmem:[%s2264_s0 + $0x90] sm:$0xff] }
   0x7   :  { %680 = vmatpush.msra.mxu3 %v1175_v8  ;;  %v1169_v17 = vld [vmem:[%s2264_s0 + $0x1a8] sm:$0xff]  ;;  %v54_v19 = vld [vmem:[%s2264_s0 + $0x98] sm:$0xff]  ;;  %v51_v21 = vld [vmem:[%s2264_s0 + $0x80] sm:$0xff] }
   0x8   :  { %70 = vmatpush.msra.mxu0 %v59_v9  ;;  %123 = vmatpush.msra.mxu1 %v60_v10  ;;  %v1167_v20 = vld [vmem:[%s2264_s0 + $0x198] sm:$0xff]  ;;  %v52_v22 = vld [vmem:[%s2264_s0 + $0x88] sm:$0xff]  ;;  %v49_v24 = vld [vmem:[%s2264_s0 + $0x70] sm:$0xff] }
   0x9   :  { %681 = vmatpush.msra.mxu3 %v1173_v11  ;;  %v1165_v23 = vld [vmem:[%s2264_s0 + $0x188] sm:$0xff]  ;;  %v50_v25 = vld [vmem:[%s2264_s0 + $0x78] sm:$0xff]  ;;  %v47_v27 = vld [vmem:[%s2264_s0 + $0x60] sm:$0xff] }
   0xa   :  { %71 = vmatpush.msra.mxu0 %v57_v12  ;;  %124 = vmatpush.msra.mxu1 %v58_v13  ;;  %v1163_v26 = vld [vmem:[%s2264_s0 + $0x178] sm:$0xff]  ;;  %v48_v28 = vld [vmem:[%s2264_s0 + $0x68] sm:$0xff]  ;;  %v1178_v29 = vld [vmem:[%s2264_s0 + $0x1f0] sm:$0xff] }
   0xb   :  { %682 = vmatpush.msra.mxu3 %v1171_v14  ;;  %v1161_v30 = vld [vmem:[%s2264_s0 + $0x168] sm:$0xff]  ;;  %v1176_v31 = vld [vmem:[%s2264_s0 + $0x1e0] sm:$0xff]  ;;  %v45_v32 = vld [vmem:[%s2264_s0 + $0x50] sm:$0xff]  ;;  %625 = vmatpush.msra.mxu2 %v1178_v29 }
   0xc   :  { %72 = vmatpush.msra.mxu0 %v55_v15  ;;  %125 = vmatpush.msra.mxu1 %v56_v16  ;;  %v46_v33 = vld [vmem:[%s2264_s0 + $0x58] sm:$0xff]  ;;  %v1174_v35 = vld [vmem:[%s2264_s0 + $0x1d0] sm:$0xff]  ;;  %v43_v36 = vld [vmem:[%s2264_s0 + $0x40] sm:$0xff] }
   0xd   :  { %683 = vmatpush.msra.mxu3 %v1169_v17  ;;  %v1159_v34 = vld [vmem:[%s2264_s0 + $0x158] sm:$0xff]  ;;  %v44_v37 = vld [vmem:[%s2264_s0 + $0x48] sm:$0xff]  ;;  %626 = vmatpush.msra.mxu2 %v1176_v31  ;;  %v1172_v39 = vld [vmem:[%s2264_s0 + $0x1c0] sm:$0xff] }
   0xe   :  { %73 = vmatpush.msra.mxu0 %v53_v18  ;;  %126 = vmatpush.msra.mxu1 %v54_v19  ;;  %v1157_v38 = vld [vmem:[%s2264_s0 + $0x148] sm:$0xff]  ;;  %v41_v40 = vld [vmem:[%s2264_s0 + $0x30] sm:$0xff]  ;;  %v42_v41 = vld [vmem:[%s2264_s0 + $0x38] sm:$0xff] }
   0xf   :  { %684 = vmatpush.msra.mxu3 %v1167_v20  ;;  %627 = vmatpush.msra.mxu2 %v1174_v35  ;;  %v1155_v42 = vld [vmem:[%s2264_s0 + $0x138] sm:$0xff]  ;;  %v1170_v43 = vld [vmem:[%s2264_s0 + $0x1b0] sm:$0xff]  ;;  %v39_v44 = vld [vmem:[%s2264_s0 + $0x20] sm:$0xff] }
  0x10   :  { %74 = vmatpush.msra.mxu0 %v51_v21  ;;  %127 = vmatpush.msra.mxu1 %v52_v22  ;;  %v40_v45 = vld [vmem:[%s2264_s0 + $0x28] sm:$0xff]  ;;  %v1168_v47 = vld [vmem:[%s2264_s0 + $0x1a0] sm:$0xff]  ;;  %v37_v48 = vld [vmem:[%s2264_s0 + $0x10] sm:$0xff] }
  0x11   :  { %685 = vmatpush.msra.mxu3 %v1165_v23  ;;  %628 = vmatpush.msra.mxu2 %v1172_v39  ;;  %v1153_v46 = vld [vmem:[%s2264_s0 + $0x128] sm:$0xff]  ;;  %v38_v49 = vld [vmem:[%s2264_s0 + $0x18] sm:$0xff]  ;;  %v1166_v51 = vld [vmem:[%s2264_s0 + $0x190] sm:$0xff] }
  0x12   :  { %75 = vmatpush.msra.mxu0 %v49_v24  ;;  %128 = vmatpush.msra.mxu1 %v50_v25  ;;  %v1151_v50 = vld [vmem:[%s2264_s0 + $0x118] sm:$0xff]  ;;  %v35_v52 = vld [vmem:[%s2264_s0] sm:$0xff]  ;;  %v36_v53 = vld [vmem:[%s2264_s0 + $0x8] sm:$0xff] }
  0x13   :  { %686 = vmatpush.msra.mxu3 %v1163_v26  ;;  %629 = vmatpush.msra.mxu2 %v1170_v43  ;;  %v23_v54 = vld [vmem:[%s2265_s1] sm:$0xff]  ;;  %v1149_v55 = vld [vmem:[%s2264_s0 + $0x108] sm:$0xff]  ;;  %v1162_v57 = vld [vmem:[%s2264_s0 + $0x170] sm:$0xff] }
  0x14   :  { %76 = vmatpush.msra.mxu0 %v47_v27  ;;  %129 = vmatpush.msra.mxu1 %v48_v28  ;;  %v1164_v56 = vld [vmem:[%s2264_s0 + $0x180] sm:$0xff]  ;;  %v1158_v59 = vld [vmem:[%s2264_s0 + $0x150] sm:$0xff]  ;;  %v24_v61 = vld [vmem:[%s2265_s1 + $0x8] sm:$0xff] }
  0x15   :  { %687 = vmatpush.msra.mxu3 %v1161_v30  ;;  %630 = vmatpush.msra.mxu2 %v1168_v47  ;;  %v1160_v58 = vld [vmem:[%s2264_s0 + $0x160] sm:$0xff]  ;;  %v1154_v62 = vld [vmem:[%s2264_s0 + $0x130] sm:$0xff]  ;;  %v26_v3 = vld [vmem:[%s2265_s1 + $0x18] sm:$0xff] }
  0x16   :  { %77 = vmatpush.msra.mxu0 %v45_v32  ;;  %130 = vmatpush.msra.mxu1 %v46_v33  ;;  %v1156_v60 = vld [vmem:[%s2264_s0 + $0x140] sm:$0xff]  ;;  %v1150_v0 = vld [vmem:[%s2264_s0 + $0x110] sm:$0xff]  ;;  %v28_v5 = vld [vmem:[%s2265_s1 + $0x28] sm:$0xff] }
  0x17   :  { %688 = vmatpush.msra.mxu3 %v1159_v34  ;;  %631 = vmatpush.msra.mxu2 %v1166_v51  ;;  %v1152_v63 = vld [vmem:[%s2264_s0 + $0x120] sm:$0xff]  ;;  %v25_v1 = vld [vmem:[%s2265_s1 + $0x10] sm:$0xff]  ;;  %v30_v7 = vld [vmem:[%s2265_s1 + $0x38] sm:$0xff] }
  0x18   :  { %78 = vmatpush.msra.mxu0 %v43_v36  ;;  %131 = vmatpush.msra.mxu1 %v44_v37  ;;  %v1148_v2 = vld [vmem:[%s2264_s0 + $0x100] sm:$0xff]  ;;  %v29_v6 = vld [vmem:[%s2265_s1 + $0x30] sm:$0xff]  ;;  %v32_v9 = vld [vmem:[%s2265_s1 + $0x48] sm:$0xff] }
  0x19   :  { %689 = vmatpush.msra.mxu3 %v1157_v38  ;;  %632 = vmatpush.msra.mxu2 %v1164_v56  ;;  %v27_v4 = vld [vmem:[%s2265_s1 + $0x20] sm:$0xff]  ;;  %v33_v36 = vld [vmem:[%s2265_s1 + $0x50] sm:$0xff] }
  0x1a   :  { %79 = vmatpush.msra.mxu0 %v41_v40  ;;  %132 = vmatpush.msra.mxu1 %v42_v41  ;;  %v31_v8 = vld [vmem:[%s2265_s1 + $0x40] sm:$0xff] }
  0x1b   :  { %690 = vmatpush.msra.mxu3 %v1155_v42  ;;  %633 = vmatpush.msra.mxu2 %v1162_v57 }
  0x1c   :  { %80 = vmatpush.msra.mxu0 %v39_v44  ;;  %133 = vmatpush.msra.mxu1 %v40_v45  ;;  %v34_v44 = vld [vmem:[%s2265_s1 + $0x58] sm:$0xff] }
  0x1d   :  { %691 = vmatpush.msra.mxu3 %v1153_v46  ;;  %634 = vmatpush.msra.mxu2 %v1160_v58  ;;  %v1570_v58 = vld [vmem:[%s2266_s2] sm:$0x3]  ;;  %s1198_s2 = smov 15  }
  0x1e   :  { %81 = vmatpush.msra.mxu0 %v37_v48  ;;  %134 = vmatpush.msra.mxu1 %v38_v49 }
  0x1f   :  { %692 = vmatpush.msra.mxu3 %v1151_v50  ;;  %635 = vmatpush.msra.mxu2 %v1158_v59 }
  0x20   :  { %82 = vmatpush.msra.mxu0 %v35_v52  ;;  %135 = vmatpush.msra.mxu1 %v36_v53 }
  0x21   :  { %83 = vmatmul.f32.vlgmr.msra.gmra.mxu0 %v23_v54  ;;  %136 = vmatmul.f32.vlgmr.msra.gmra.mxu1 %v23_v54 }
  0x22   :  { %693 = vmatpush.msra.mxu3 %v1149_v55  ;;  %636 = vmatpush.msra.mxu2 %v1156_v60  ;;  %v1573_v60 = vperm.slane %v1570_v58, 1 }
  0x23   :  { %694 = vmatmul.f32.vlgmr.msra.gmra.mxu3 %v23_v54 }
  0x24   :  { %637 = vmatpush.msra.mxu2 %v1154_v62  ;;  %vm22_vm4 = vcmp.eq.s32.totalorder %v1573_v60, 1  ;;  %vm18_vm7 = vcmp.eq.s32.totalorder %v1573_v60, 0  ;;  %vm20_vm10 = vcmp.eq.s32.totalorder %v1573_v60, 13 }
  0x26   :  { %638 = vmatpush.msra.mxu2 %v1152_v63 }
  0x28   :  { %639 = vmatpush.msra.mxu2 %v1150_v0 }
  0x29   :  { %139 = vmatmul.f32.gmra.mxu1 %v24_v61  ;;  %86 = vmatmul.f32.gmra.mxu0 %v24_v61 }
  0x2a   :  { %640 = vmatpush.msra.mxu2 %v1148_v2 }
  0x2b   :  { %697 = vmatmul.f32.gmra.mxu3 %v24_v61  ;;  %641 = vmatmul.f32.vlgmr.msra.gmra.mxu2 %v23_v54 }
  0x31   :  { %142 = vmatmul.f32.gmra.mxu1 %v25_v1  ;;  %89 = vmatmul.f32.gmra.mxu0 %v25_v1 }
  0x33   :  { %700 = vmatmul.f32.gmra.mxu3 %v25_v1  ;;  %644 = vmatmul.f32.gmra.mxu2 %v24_v61 }
  0x39   :  { %145 = vmatmul.f32.gmra.mxu1 %v26_v3  ;;  %92 = vmatmul.f32.gmra.mxu0 %v26_v3 }
  0x3b   :  { %703 = vmatmul.f32.gmra.mxu3 %v26_v3  ;;  %647 = vmatmul.f32.gmra.mxu2 %v25_v1 }
  0x41   :  { %148 = vmatmul.f32.gmra.mxu1 %v27_v4  ;;  %95 = vmatmul.f32.gmra.mxu0 %v27_v4 }
  0x43   :  { %706 = vmatmul.f32.gmra.mxu3 %v27_v4  ;;  %650 = vmatmul.f32.gmra.mxu2 %v26_v3 }
  0x49   :  { %151 = vmatmul.f32.gmra.mxu1 %v28_v5  ;;  %98 = vmatmul.f32.gmra.mxu0 %v28_v5 }
  0x4b   :  { %709 = vmatmul.f32.gmra.mxu3 %v28_v5  ;;  %653 = vmatmul.f32.gmra.mxu2 %v27_v4 }
  0x51   :  { %154 = vmatmul.f32.gmra.mxu1 %v29_v6  ;;  %101 = vmatmul.f32.gmra.mxu0 %v29_v6 }
  0x53   :  { %712 = vmatmul.f32.gmra.mxu3 %v29_v6  ;;  %656 = vmatmul.f32.gmra.mxu2 %v28_v5 }
  0x59   :  { %157 = vmatmul.f32.gmra.mxu1 %v30_v7  ;;  %104 = vmatmul.f32.gmra.mxu0 %v30_v7 }
  0x5b   :  { %715 = vmatmul.f32.gmra.mxu3 %v30_v7  ;;  %659 = vmatmul.f32.gmra.mxu2 %v29_v6 }
  0x61   :  { %160 = vmatmul.f32.gmra.mxu1 %v31_v8  ;;  %107 = vmatmul.f32.gmra.mxu0 %v31_v8 }
  0x63   :  { %718 = vmatmul.f32.gmra.mxu3 %v31_v8  ;;  %662 = vmatmul.f32.gmra.mxu2 %v30_v7 }
  0x69   :  { %163 = vmatmul.f32.gmra.mxu1 %v32_v9  ;;  %110 = vmatmul.f32.gmra.mxu0 %v32_v9 }
  0x6b   :  { %721 = vmatmul.f32.gmra.mxu3 %v32_v9  ;;  %665 = vmatmul.f32.gmra.mxu2 %v31_v8 }
  0x71   :  { %166 = vmatmul.f32.gmra.mxu1 %v33_v36  ;;  %113 = vmatmul.f32.gmra.mxu0 %v33_v36 }
  0x73   :  { %668 = vmatmul.f32.gmra.mxu2 %v32_v9  ;;  %724 = vmatmul.f32.gmra.mxu3 %v33_v36 }
  0x79   :  { %169 = vmatmul.f32.gmra.mxu1 %v34_v44  ;;  %116 = vmatmul.f32.gmra.mxu0 %v34_v44 }
  0x7b   :  { %671 = vmatmul.f32.gmra.mxu2 %v33_v36  ;;  %727 = vmatmul.f32.gmra.mxu3 %v34_v44 }
  0x83   :  { %674 = vmatmul.f32.gmra.mxu2 %v34_v44 }
  0x9e   :  { %v84_v10 = vpop.f32.mrf.mxu0  ;;  %v137_v11 = vpop.f32.mrf.mxu1 }
  0x9f   :  { %175 = vst.msk [vmem:[#allocation2 + $0x10] sm:$0xff] %vm174_vm0, %v137_v11  ;;  %210 = vrot.lane.b32.xlu0 %v137_v11, %s1194_s24  ;;  %285 = vrot.lane.b32.xlu1 %v84_v10, %s1195_s25 }
  0xa6   :  { %v695_v12 = vpop.f32.mrf.mxu3  ;;  %v261_v13 = vld [vmem:[#allocation2 + $0x10] sm:$0xff]  ;;  %v140_v14 = vpop.f32.mrf.mxu1 }
  0xa7   :  { %767 = vrot.lane.b32.xlu0 %v695_v12, %s1194_s24  ;;  %287 = vrot.lane.b32.xlu2 %v261_v13, %s1195_s25  ;;  %732 = vst.msk [vmem:[#allocation2 + $0x10] sm:$0xff] %vm174_vm0, %v695_v12  ;;  %v87_v22 = vpop.f32.mrf.mxu0 }
  0xa8   :  { %177 = vst.msk [vmem:[#allocation2 + $0x30] sm:$0xff] %vm174_vm0, %v140_v14  ;;  %326 = vrot.lane.b32.xlu1 %v84_v10, %s1196_s26 }
  0xae   :  { %v698_v15 = vpop.f32.mrf.mxu3  ;;  %v143_v16 = vpop.f32.mrf.mxu1  ;;  %v1468_v26 = vld [vmem:[#allocation2 + $0x10] sm:$0xff] }
  0xaf   :  { %328 = vrot.lane.b32.xlu2 %v261_v13, %s1196_s26  ;;  %212 = vrot.lane.b32.xlu0 %v140_v14, %s1194_s24  ;;  %v264_v17 = vld [vmem:[#allocation2 + $0x30] sm:$0xff]  ;;  %179 = vst.msk [vmem:[#allocation2 + $0x50] sm:$0xff] %vm174_vm0, %v143_v16  ;;  %v1455_v18 = vpop.f32.mrf.mxu2  ;;  %v90_v38 = vpop.f32.mrf.mxu0 }
  0xb0   :  { %734 = vst.msk [vmem:[#allocation2 + $0x30] sm:$0xff] %vm174_vm0, %v698_v15  ;;  %769 = vrot.lane.b32.xlu1 %v698_v15, %s1194_s24 }
  0xb6   :  { %v701_v19 = vpop.f32.mrf.mxu3  ;;  %v267_v20 = vld [vmem:[#allocation2 + $0x50] sm:$0xff]  ;;  %v146_v21 = vpop.f32.mrf.mxu1 }
  0xb7   :  { %293 = vrot.lane.b32.xlu2 %v264_v17, %s1195_s25  ;;  %736 = vst.msk [vmem:[#allocation2 + $0x50] sm:$0xff] %vm174_vm0, %v701_v19  ;;  %v1479_v29 = vpop.f32.mrf.mxu2  ;;  %v1523_v43 = vld [vmem:[#allocation2 + $0x30] sm:$0xff]  ;;  %v93_v50 = vpop.f32.mrf.mxu0 }
  0xb8   :  { %214 = vrot.lane.b32.xlu1 %v143_v16, %s1194_s24  ;;  %181 = vst.msk [vmem:[#allocation2 + $0x70] sm:$0xff] %vm174_vm0, %v146_v21 }
  0xbe   :  { %v149_v23 = vpop.f32.mrf.mxu1  ;;  %v704_v24 = vpop.f32.mrf.mxu3  ;;  %v1554_v53 = vld [vmem:[#allocation2 + $0x50] sm:$0xff] }
  0xbf   :  { %334 = vrot.lane.b32.xlu2 %v264_v17, %s1196_s26  ;;  %183 = vst.msk [vmem:[#allocation2 + $0x90] sm:$0xff] %vm174_vm0, %v149_v23  ;;  %773 = vrot.lane.b32.xlu0 %v704_v24, %s1194_s24  ;;  %v1465_v25 = vld [vmem:[#allocation2 + $0x70] sm:$0xff]  ;;  %v1517_v41 = vpop.f32.mrf.mxu2  ;;  %v96_v59 = vpop.f32.mrf.mxu0 }
  0xc0   :  { %291 = vrot.lane.b32.xlu1 %v87_v22, %s1195_s25  ;;  %738 = vst.msk [vmem:[#allocation2 + $0x70] sm:$0xff] %vm174_vm0, %v704_v24 }
  0xc6   :  { %v1472_v27 = vpop.f32.mrf.mxu1  ;;  %v1474_v28 = vpop.f32.mrf.mxu3  ;;  %v1481_v30 = vld [vmem:[#allocation2 + $0x90] sm:$0xff] }
  0xc7   :  { %843 = vrot.lane.b32.xlu2 %v1468_v26, %s1195_s25  ;;  %185 = vst.msk [vmem:[#allocation2 + $0xb0] sm:$0xff] %vm174_vm0, %v1472_v27  ;;  %v1552_v52 = vpop.f32.mrf.mxu2  ;;  %v1598_v7 = vld [vmem:[#allocation2 + $0x70] sm:$0xff]  ;;  %v99_v11 = vpop.f32.mrf.mxu0 }
  0xc8   :  { %332 = vrot.lane.b32.xlu1 %v87_v22, %s1196_s26  ;;  %740 = vst.msk [vmem:[#allocation2 + $0x90] sm:$0xff] %vm174_vm0, %v1474_v28 }
  0xce   :  { %v155_v31 = vpop.f32.mrf.mxu1  ;;  %v1486_v32 = vpop.f32.mrf.mxu3  ;;  %v1492_v33 = vld [vmem:[#allocation2 + $0xb0] sm:$0xff] }
  0xcf   :  { %771 = vrot.lane.b32.xlu2 %v701_v19, %s1194_s24  ;;  %187 = vst.msk [vmem:[#allocation2 + $0xd0] sm:$0xff] %vm174_vm0, %v155_v31  ;;  %222 = vrot.lane.b32.xlu0 %v155_v31, %s1194_s24 }
  0xd0   :  { %841 = vrot.lane.b32.xlu1 %v1455_v18, %s1195_s25  ;;  %742 = vst.msk [vmem:[#allocation2 + $0xb0] sm:$0xff] %vm174_vm0, %v1486_v32 }
  0xd6   :  { %v1497_v34 = vpop.f32.mrf.mxu1  ;;  %v713_v35 = vpop.f32.mrf.mxu3  ;;  %v1506_v37 = vld [vmem:[#allocation2 + $0xd0] sm:$0xff] }
  0xd7   :  { %299 = vrot.lane.b32.xlu2 %v267_v20, %s1195_s25  ;;  %189 = vst.msk [vmem:[#allocation2 + $0xf0] sm:$0xff] %vm174_vm0, %v1497_v34  ;;  %779 = vrot.lane.b32.xlu0 %v713_v35, %s1194_s24 }
  0xd8   :  { %216 = vrot.lane.b32.xlu1 %v146_v21, %s1194_s24  ;;  %744 = vst.msk [vmem:[#allocation2 + $0xd0] sm:$0xff] %vm174_vm0, %v713_v35 }
  0xde   :  { %v1510_v39 = vpop.f32.mrf.mxu3  ;;  %v1513_v40 = vpop.f32.mrf.mxu1  ;;  %v1519_v42 = vld [vmem:[#allocation2 + $0xf0] sm:$0xff] }
  0xdf   :  { %340 = vrot.lane.b32.xlu2 %v267_v20, %s1196_s26  ;;  %191 = vst.msk [vmem:[#allocation2 + $0x110] sm:$0xff] %vm174_vm0, %v1513_v40 }
  0xe0   :  { %297 = vrot.lane.b32.xlu1 %v90_v38, %s1195_s25  ;;  %746 = vst.msk [vmem:[#allocation2 + $0xf0] sm:$0xff] %vm174_vm0, %v1510_v39 }
  0xe6   :  { %v1530_v45 = vpop.f32.mrf.mxu3  ;;  %v164_v46 = vpop.f32.mrf.mxu1  ;;  %v1535_v47 = vld [vmem:[#allocation2 + $0x110] sm:$0xff] }
  0xe7   :  { %849 = vrot.lane.b32.xlu2 %v1523_v43, %s1195_s25  ;;  %193 = vst.msk [vmem:[#allocation2 + $0x130] sm:$0xff] %vm174_vm0, %v164_v46  ;;  %228 = vrot.lane.b32.xlu0 %v164_v46, %s1194_s24 }
  0xe8   :  { %338 = vrot.lane.b32.xlu1 %v90_v38, %s1196_s26  ;;  %748 = vst.msk [vmem:[#allocation2 + $0x110] sm:$0xff] %vm174_vm0, %v1530_v45 }
  0xee   :  { %v722_v48 = vpop.f32.mrf.mxu3  ;;  %v1543_v49 = vld [vmem:[#allocation2 + $0x130] sm:$0xff]  ;;  %v167_v36 = vpop.f32.mrf.mxu1 }
  0xef   :  { %218 = vrot.lane.b32.xlu2 %v149_v23, %s1194_s24  ;;  %785 = vrot.lane.b32.xlu0 %v722_v48, %s1194_s24  ;;  %750 = vst.msk [vmem:[#allocation2 + $0x130] sm:$0xff] %vm174_vm0, %v722_v48 }
  0xf0   :  { %847 = vrot.lane.b32.xlu1 %v1479_v29, %s1195_s25  ;;  %195 = vst.msk [vmem:[#allocation2 + $0x150] sm:$0xff] %vm174_vm0, %v167_v36 }
  0xf7   :  { %305 = vrot.lane.b32.xlu2 %v1465_v25, %s1195_s25 }
  0xf8   :  { %303 = vrot.lane.b32.xlu1 %v93_v50, %s1195_s25 }
  0xff   :  { %346 = vrot.lane.b32.xlu2 %v1465_v25, %s1196_s26 }
 0x100   :  { %344 = vrot.lane.b32.xlu1 %v93_v50, %s1196_s26 }
 0x101   :  { %v288_v51 = vpop.permute.xlu2 %287 }
 0x107   :  { %855 = vrot.lane.b32.xlu2 %v1554_v53, %s1195_s25 }
 0x108   :  { %853 = vrot.lane.b32.xlu1 %v1517_v41, %s1195_s25 }
 0x109   :  { %v329_v54 = vpop.permute.xlu2 %328 }
 0x10f   :  { %220 = vrot.lane.b32.xlu2 %v1472_v27, %s1194_s24  ;;  %v102_v27 = vpop.f32.mrf.mxu0 }
 0x110   :  { %775 = vrot.lane.b32.xlu1 %v1474_v28, %s1194_s24 }
 0x111   :  { %v211_v55 = vpop.permute.xlu0 %210  ;;  %v294_v56 = vpop.permute.xlu2 %293 }
 0x112   :  { %247 = vst.msk [vmem:[#allocation2] sm:$0xff] %vm246_vm1, %v211_v55  ;;  %v1565_v57 = vpop.permute.xlu1 %285 }
 0x113   :  { %v309_v1 = vsel %vm307_vm2, %v1565_v57, %v288_v51 }
 0x117   :  { %409 = vrot.lane.b32.xlu2 %v1481_v30, %s1197_s5 }
 0x118   :  { %407 = vrot.lane.b32.xlu1 %v96_v59, %s1197_s5 }
 0x119   :  { %v768_v61 = vpop.permute.xlu0 %767  ;;  %v335_v62 = vpop.permute.xlu2 %334  ;;  %v259_v63 = vld [vmem:[#allocation2] sm:$0xff] }
 0x11a   :  { %803 = vst.msk [vmem:[#allocation2] sm:$0xff] %vm246_vm1, %v768_v61  ;;  %283 = vrot.lane.b32.xlu0 %v259_v63, %s1195_s25  ;;  %v1581_v0 = vpop.permute.xlu1 %326 }
 0x11b   :  { %v350_v2 = vsel %vm348_vm3, %v1581_v0, %v329_v54 }
 0x11c   :  { %v1589_v3 = vsel %vm22_vm4, %v309_v1, %v350_v2  ;;  %v725_v1 = vpop.f32.mrf.mxu3  ;;  %v503_v2 = vld [vmem:[#allocation2 + $0x150] sm:$0xff] }
 0x11d   :  { %752 = vst.msk [vmem:[#allocation2 + $0x150] sm:$0xff] %vm174_vm0, %v725_v1 }
 0x11f   :  { %450 = vrot.lane.b32.xlu2 %v1481_v30, %s1198_s2 }
 0x120   :  { %448 = vrot.lane.b32.xlu1 %v96_v59, %s1198_s2 }
 0x121   :  { %v213_v4 = vpop.permute.xlu0 %212  ;;  %v1594_v5 = vpop.permute.xlu2 %843  ;;  %v815_v16 = vld [vmem:[#allocation2] sm:$0xff] }
 0x122   :  { %248 = vst.msk [vmem:[#allocation2 + $0x20] sm:$0xff] %vm246_vm1, %v213_v4  ;;  %324 = vrot.lane.b32.xlu0 %v259_v63, %s1196_s26  ;;  %v770_v6 = vpop.permute.xlu1 %769 }
 0x127   :  { %861 = vrot.lane.b32.xlu2 %v1598_v7, %s1195_s25 }
 0x128   :  { %859 = vrot.lane.b32.xlu1 %v1552_v52, %s1195_s25 }
 0x129   :  { %v772_v8 = vpop.permute.xlu2 %771  ;;  %v262_v9 = vld [vmem:[#allocation2 + $0x20] sm:$0xff] }
 0x12a   :  { %289 = vrot.lane.b32.xlu0 %v262_v9, %s1195_s25  ;;  %804 = vst.msk [vmem:[#allocation2 + $0x20] sm:$0xff] %vm246_vm1, %v770_v6  ;;  %v215_v10 = vpop.permute.xlu1 %214 }
 0x12b   :  { %249 = vst.msk [vmem:[#allocation2 + $0x40] sm:$0xff] %vm246_vm1, %v215_v10 }
 0x12f   :  { %777 = vrot.lane.b32.xlu2 %v1486_v32, %s1194_s24 }
 0x130   :  { %413 = vrot.lane.b32.xlu1 %v99_v11, %s1197_s5 }
 0x131   :  { %v300_v12 = vpop.permute.xlu2 %299  ;;  %v774_v19 = vpop.permute.xlu0 %773  ;;  %v818_v38 = vld [vmem:[#allocation2 + $0x20] sm:$0xff] }
 0x132   :  { %330 = vrot.lane.b32.xlu0 %v262_v9, %s1196_s26  ;;  %v1611_v13 = vpop.permute.xlu1 %291  ;;  %v265_v14 = vld [vmem:[#allocation2 + $0x40] sm:$0xff] }
 0x133   :  { %805 = vst.msk [vmem:[#allocation2 + $0x40] sm:$0xff] %vm246_vm1, %v772_v8  ;;  %v311_v20 = vsel %vm307_vm2, %v1611_v13, %v294_v56  ;;  %v170_v56 = vpop.f32.mrf.mxu1 }
 0x134   :  { %197 = vst.msk [vmem:[#allocation2 + $0x170] sm:$0xff] %vm174_vm0, %v170_v56 }
 0x137   :  { %415 = vrot.lane.b32.xlu2 %v1492_v33, %s1197_s5 }
 0x138   :  { %454 = vrot.lane.b32.xlu1 %v99_v11, %s1198_s2 }
 0x139   :  { %v341_v15 = vpop.permute.xlu2 %340 }
 0x13a   :  { %839 = vrot.lane.b32.xlu0 %v815_v16, %s1195_s25  ;;  %v1618_v17 = vpop.permute.xlu1 %332  ;;  %v821_v10 = vld [vmem:[#allocation2 + $0x40] sm:$0xff] }
 0x13b   :  { %v352_v21 = vsel %vm348_vm3, %v1618_v17, %v335_v62 }
 0x13c   :  { %v1626_v22 = vsel %vm22_vm4, %v311_v20, %v352_v21 }
 0x13f   :  { %456 = vrot.lane.b32.xlu2 %v1492_v33, %s1198_s2 }
 0x140   :  { %224 = vrot.lane.b32.xlu1 %v1497_v34, %s1194_s24 }
 0x141   :  { %v1632_v23 = vpop.permute.xlu2 %849  ;;  %v223_v25 = vpop.permute.xlu0 %222 }
 0x142   :  { %879 = vrot.lane.b32.xlu0 %v815_v16, %s1196_s26  ;;  %v1635_v24 = vpop.permute.xlu1 %841  ;;  %253 = vst.msk [vmem:[#allocation2 + $0xc0] sm:$0xff] %vm246_vm1, %v223_v25 }
 0x147   :  { %421 = vrot.lane.b32.xlu2 %v1506_v37, %s1197_s5 }
 0x148   :  { %419 = vrot.lane.b32.xlu1 %v102_v27, %s1197_s5 }
 0x149   :  { %v219_v28 = vpop.permute.xlu2 %218  ;;  %v780_v31 = vpop.permute.xlu0 %779  ;;  %v1644_v32 = vld [vmem:[#allocation2 + $0xc0] sm:$0xff] }
 0x14a   :  { %251 = vst.msk [vmem:[#allocation2 + $0x80] sm:$0xff] %vm246_vm1, %v219_v28  ;;  %295 = vrot.lane.b32.xlu0 %v265_v14, %s1195_s25  ;;  %v217_v30 = vpop.permute.xlu1 %216  ;;  %v1727_v28 = vperm.slane %v1570_v58, 0 }
 0x14b   :  { %250 = vst.msk [vmem:[#allocation2 + $0x60] sm:$0xff] %vm246_vm1, %v217_v30 }
 0x14c   :  { %809 = vst.msk [vmem:[#allocation2 + $0xc0] sm:$0xff] %vm246_vm1, %v780_v31  ;;  %vm21_vm8 = vcmp.eq.s32.totalorder %v1727_v28, 1  ;;  %vm17_vm11 = vcmp.eq.s32.totalorder %v1727_v28, 0  ;;  %vm19_vm12 = vcmp.eq.s32.totalorder %v1727_v28, 13 }
 0x14f   :  { %462 = vrot.lane.b32.xlu2 %v1506_v37, %s1198_s2 }
 0x150   :  { %460 = vrot.lane.b32.xlu1 %v102_v27, %s1198_s2 }
 0x151   :  { %v306_v33 = vpop.permute.xlu2 %305 }
 0x152   :  { %336 = vrot.lane.b32.xlu0 %v265_v14, %s1196_s26  ;;  %v1651_v34 = vpop.permute.xlu1 %297  ;;  %v268_v35 = vld [vmem:[#allocation2 + $0x60] sm:$0xff]  ;;  %v728_v14 = vpop.f32.mrf.mxu3 }
 0x153   :  { %806 = vst.msk [vmem:[#allocation2 + $0x60] sm:$0xff] %vm246_vm1, %v774_v19  ;;  %v313_v46 = vsel %vm307_vm2, %v1651_v34, %v300_v12  ;;  %v381_v19 = vld [vmem:[#allocation2 + $0x80] sm:$0xff] }
 0x157   :  { %226 = vrot.lane.b32.xlu2 %v1513_v40, %s1194_s24 }
 0x158   :  { %781 = vrot.lane.b32.xlu1 %v1510_v39, %s1194_s24  ;;  %v105_v39 = vpop.f32.mrf.mxu0 }
 0x159   :  { %v347_v37 = vpop.permute.xlu2 %346  ;;  %v229_v50 = vpop.permute.xlu0 %228 }
 0x15a   :  { %845 = vrot.lane.b32.xlu0 %v818_v38, %s1195_s25  ;;  %v1660_v44 = vpop.permute.xlu1 %338  ;;  %256 = vst.msk [vmem:[#allocation2 + $0x120] sm:$0xff] %vm246_vm1, %v229_v50 }
 0x15b   :  { %v354_v48 = vsel %vm348_vm3, %v1660_v44, %v341_v15  ;;  %v506_v15 = vld [vmem:[#allocation2 + $0x170] sm:$0xff] }
 0x15c   :  { %v1668_v40 = vsel %vm22_vm4, %v313_v46, %v354_v48  ;;  %754 = vst.msk [vmem:[#allocation2 + $0x170] sm:$0xff] %vm174_vm0, %v728_v14 }
 0x15f   :  { %427 = vrot.lane.b32.xlu2 %v1519_v42, %s1197_s5 }
 0x160   :  { %425 = vrot.lane.b32.xlu1 %v105_v39, %s1197_s5  ;;  %v108_v63 = vpop.f32.mrf.mxu0 }
 0x161   :  { %v1674_v51 = vpop.permute.xlu2 %855  ;;  %v786_v55 = vpop.permute.xlu0 %785  ;;  %v1679_v59 = vld [vmem:[#allocation2 + $0x120] sm:$0xff] }
 0x162   :  { %885 = vrot.lane.b32.xlu0 %v818_v38, %s1196_s26  ;;  %v1677_v54 = vpop.permute.xlu1 %847  ;;  %812 = vst.msk [vmem:[#allocation2 + $0x120] sm:$0xff] %vm246_vm1, %v786_v55  ;;  %v824_v55 = vld [vmem:[#allocation2 + $0x60] sm:$0xff] }
 0x167   :  { %468 = vrot.lane.b32.xlu2 %v1519_v42, %s1198_s2 }
 0x168   :  { %466 = vrot.lane.b32.xlu1 %v105_v39, %s1198_s2  ;;  %v111_v12 = vpop.f32.mrf.mxu0 }
 0x169   :  { %v221_v61 = vpop.permute.xlu2 %220 }
 0x16a   :  { %252 = vst.msk [vmem:[#allocation2 + $0xa0] sm:$0xff] %vm246_vm1, %v221_v61  ;;  %301 = vrot.lane.b32.xlu0 %v268_v35, %s1195_s25  ;;  %v1688_v62 = vpop.permute.xlu1 %303  ;;  %v1759_v61 = vpop.f32.mrf.mxu2 }
 0x16b   :  { %v315_v6 = vsel %vm307_vm2, %v1688_v62, %v306_v33 }
 0x16f   :  { %783 = vrot.lane.b32.xlu2 %v1530_v45, %s1194_s24 }
 0x170   :  { %521 = vrot.lane.b32.xlu1 %v108_v63, %s1199_s6 }
 0x171   :  { %v410_v42 = vpop.permute.xlu2 %409  ;;  %v384_v21 = vld [vmem:[#allocation2 + $0xa0] sm:$0xff] }
 0x172   :  { %342 = vrot.lane.b32.xlu0 %v268_v35, %s1196_s26  ;;  %v1695_v4 = vpop.permute.xlu1 %344  ;;  %v374_v35 = vsel %vm18_vm7, 0.0, %v1589_v3 }
 0x173   :  { %v356_v8 = vsel %vm348_vm3, %v1695_v4, %v347_v37 }
 0x174   :  { %v1703_v9 = vsel %vm22_vm4, %v315_v6, %v356_v8 }
 0x177   :  { %523 = vrot.lane.b32.xlu2 %v1535_v47, %s1199_s6 }
 0x178   :  { %230 = vrot.lane.b32.xlu1 %v167_v36, %s1194_s24 }
 0x179   :  { %v451_v45 = vpop.permute.xlu2 %450 }
 0x17a   :  { %851 = vrot.lane.b32.xlu0 %v821_v10, %s1195_s25  ;;  %v1709_v11 = vpop.permute.xlu1 %853 }
 0x17f   :  { %529 = vrot.lane.b32.xlu2 %v1543_v49, %s1199_s6  ;;  %v114_v49 = vpop.f32.mrf.mxu0 }
 0x180   :  { %527 = vrot.lane.b32.xlu1 %v111_v12, %s1199_s6 }
 0x181   :  { %v1715_v16 = vpop.permute.xlu2 %861 }
 0x182   :  { %891 = vrot.lane.b32.xlu0 %v821_v10, %s1196_s26  ;;  %v776_v47 = vpop.permute.xlu1 %775 }
 0x183   :  { %807 = vst.msk [vmem:[#allocation2 + $0x80] sm:$0xff] %vm246_vm1, %v776_v47 }
 0x187   :  { %232 = vrot.lane.b32.xlu2 %v170_v56, %s1194_s24  ;;  %v117_v48 = vpop.f32.mrf.mxu0 }
 0x188   :  { %787 = vrot.lane.b32.xlu1 %v725_v1, %s1194_s24 }
 0x189   :  { %v778_v20 = vpop.permute.xlu2 %777 }
 0x18a   :  { %405 = vrot.lane.b32.xlu0 %v381_v19, %s1197_s5  ;;  %v1722_v25 = vpop.permute.xlu1 %407  ;;  %808 = vst.msk [vmem:[#allocation2 + $0xa0] sm:$0xff] %vm246_vm1, %v778_v20 }
 0x18b   :  { %v431_v33 = vsel %vm429_vm5, %v1722_v25, %v410_v42 }
 0x18c   :  { %v284_v27 = vpop.permute.xlu0 %283 }
 0x18d   :  { %v308_v38 = vsel %vm307_vm2, %v284_v27, %v1565_v57 }
 0x18f   :  { %535 = vrot.lane.b32.xlu2 %v503_v2, %s1199_s6 }
 0x190   :  { %533 = vrot.lane.b32.xlu1 %v114_v49, %s1199_s6 }
 0x191   :  { %v416_v30 = vpop.permute.xlu2 %415 }
 0x192   :  { %446 = vrot.lane.b32.xlu0 %v381_v19, %s1198_s2  ;;  %v1732_v31 = vpop.permute.xlu1 %448 }
 0x193   :  { %v472_v58 = vsel %vm470_vm6, %v1732_v31, %v451_v45 }
 0x194   :  { %v325_v36 = vpop.permute.xlu0 %324  ;;  %v488_v37 = vsel %vm18_vm7, %v431_v33, %v472_v58 }
 0x195   :  { %v349_v46 = vsel %vm348_vm3, %v325_v36, %v1581_v0  ;;  %v1748_v50 = vadd.f32 %v488_v37, %v374_v35 }
 0x196   :  { %v1752_v39 = vsel %vm21_vm8, %v308_v38, %v349_v46  ;;  %v937_v38 = vld [vmem:[#allocation2 + $0x90] sm:$0xff] }
 0x197   :  { %789 = vrot.lane.b32.xlu2 %v728_v14, %s1194_s24 }
 0x198   :  { %539 = vrot.lane.b32.xlu1 %v117_v48, %s1199_s6 }
 0x199   :  { %v457_v3 = vpop.permute.xlu2 %456 }
 0x19a   :  { %857 = vrot.lane.b32.xlu0 %v824_v55, %s1195_s25  ;;  %v1757_v56 = vpop.permute.xlu1 %859 }
 0x19c   :  { %v290_v57 = vpop.permute.xlu0 %289 }
 0x19d   :  { %v310_v2 = vsel %vm307_vm2, %v290_v57, %v1611_v13 }
 0x19f   :  { %541 = vrot.lane.b32.xlu2 %v506_v15, %s1199_s6 }
 0x1a0   :  { %881 = vrot.lane.b32.xlu1 %v1455_v18, %s1196_s26  ;;  %v1777_v18 = vpop.f32.mrf.mxu2 }
 0x1a1   :  { %v422_v0 = vpop.permute.xlu2 %421 }
 0x1a2   :  { %897 = vrot.lane.b32.xlu0 %v824_v55, %s1196_s26  ;;  %v1765_v63 = vpop.permute.xlu1 %413 }
 0x1a3   :  { %v433_v13 = vsel %vm429_vm5, %v1765_v63, %v416_v30  ;;  %v378_v30 = vsel %vm18_vm7, 0.0, %v1668_v40 }
 0x1a4   :  { %v331_v1 = vpop.permute.xlu0 %330 }
 0x1a5   :  { %v351_v42 = vsel %vm348_vm3, %v331_v1, %v1618_v17  ;;  %v943_v1 = vld [vmem:[#allocation2 + $0xd0] sm:$0xff] }
 0x1a6   :  { %v1773_v6 = vsel %vm21_vm8, %v310_v2, %v351_v42  ;;  %v938_v42 = vld [vmem:[#allocation2 + $0xa0] sm:$0xff] }
 0x1a7   :  { %883 = vrot.lane.b32.xlu2 %v1468_v26, %s1196_s26  ;;  %v376_v26 = vsel %vm18_vm7, 0.0, %v1626_v22 }
 0x1a8   :  { %887 = vrot.lane.b32.xlu1 %v1479_v29, %s1196_s26  ;;  %v1799_v14 = vpop.f32.mrf.mxu2 }
 0x1a9   :  { %v463_v8 = vpop.permute.xlu2 %462 }
 0x1aa   :  { %411 = vrot.lane.b32.xlu0 %v384_v21, %s1197_s5  ;;  %v1782_v45 = vpop.permute.xlu1 %454 }
 0x1ab   :  { %v474_v17 = vsel %vm470_vm6, %v1782_v45, %v457_v3  ;;  %v940_v3 = vld [vmem:[#allocation2 + $0xb0] sm:$0xff] }
 0x1ac   :  { %v1791_v10 = vpop.permute.xlu0 %839  ;;  %v490_v29 = vsel %vm18_vm7, %v433_v13, %v474_v17  ;;  %v380_v17 = vsel %vm18_vm7, 0.0, %v1703_v9 }
 0x1ad   :  { %v1795_v12 = vadd.f32 %v490_v29, %v376_v26 }
 0x1af   :  { %889 = vrot.lane.b32.xlu2 %v1523_v43, %s1196_s26 }
 0x1b0   :  { %893 = vrot.lane.b32.xlu1 %v1517_v41, %s1196_s26  ;;  %v1810_v19 = vpop.f32.mrf.mxu2  ;;  %v935_v41 = vld [vmem:[#allocation2 + $0x80] sm:$0xff] }
 0x1b1   :  { %v227_v15 = vpop.permute.xlu2 %226 }
 0x1b2   :  { %255 = vst.msk [vmem:[#allocation2 + $0x100] sm:$0xff] %vm246_vm1, %v227_v15  ;;  %452 = vrot.lane.b32.xlu0 %v384_v21, %s1198_s2  ;;  %v225_v22 = vpop.permute.xlu1 %224 }
 0x1b3   :  { %254 = vst.msk [vmem:[#allocation2 + $0xe0] sm:$0xff] %vm246_vm1, %v225_v22 }
 0x1b4   :  { %v1806_v47 = vpop.permute.xlu0 %879 }
 0x1b7   :  { %895 = vrot.lane.b32.xlu2 %v1554_v53, %s1196_s26 }
 0x1b8   :  { %899 = vrot.lane.b32.xlu1 %v1552_v52, %s1196_s26  ;;  %v666_v22 = vpop.f32.mrf.mxu2 }
 0x1b9   :  { %v428_v43 = vpop.permute.xlu2 %427  ;;  %v1846_v46 = vld [vmem:[#allocation2 + $0x100] sm:$0xff] }
 0x1ba   :  { %959 = vrot.lane.b32.xlu0 %v935_v41, %s1197_s5  ;;  %v1815_v20 = vpop.permute.xlu1 %419 }
 0x1bb   :  { %v435_v52 = vsel %vm429_vm5, %v1815_v20, %v422_v0 }
 0x1bc   :  { %v296_v21 = vpop.permute.xlu0 %295 }
 0x1bd   :  { %v312_v58 = vsel %vm307_vm2, %v296_v21, %v1651_v34 }
 0x1bf   :  { %901 = vrot.lane.b32.xlu2 %v1598_v7, %s1196_s26 }
 0x1c0   :  { %961 = vrot.lane.b32.xlu1 %v1759_v61, %s1197_s5 }
 0x1c1   :  { %v469_v49 = vpop.permute.xlu2 %468 }
 0x1c2   :  { %999 = vrot.lane.b32.xlu0 %v935_v41, %s1198_s2  ;;  %v1822_v53 = vpop.permute.xlu1 %460  ;;  %v946_v41 = vld [vmem:[#allocation2 + $0xf0] sm:$0xff] }
 0x1c3   :  { %v476_v27 = vsel %vm470_vm6, %v1822_v53, %v463_v8 }
 0x1c4   :  { %v337_v33 = vpop.permute.xlu0 %336  ;;  %v492_v7 = vsel %vm18_vm7, %v435_v52, %v476_v27 }
 0x1c5   :  { %v353_v35 = vsel %vm348_vm3, %v337_v33, %v1660_v44  ;;  %v1837_v36 = vadd.f32 %v492_v7, %v378_v30  ;;  %v390_v44 = vld [vmem:[#allocation2 + $0xe0] sm:$0xff]  ;;  %v669_v7 = vpop.f32.mrf.mxu2 }
 0x1c6   :  { %v1841_v37 = vsel %vm21_vm8, %v312_v58, %v353_v35 }
 0x1c7   :  { %963 = vrot.lane.b32.xlu2 %v937_v38, %s1197_s5 }
 0x1c8   :  { %967 = vrot.lane.b32.xlu1 %v1777_v18, %s1197_s5 }
 0x1c9   :  { %v784_v40 = vpop.permute.xlu2 %783 }
 0x1ca   :  { %417 = vrot.lane.b32.xlu0 %v1644_v32, %s1197_s5  ;;  %v782_v34 = vpop.permute.xlu1 %781  ;;  %811 = vst.msk [vmem:[#allocation2 + $0x100] sm:$0xff] %vm246_vm1, %v784_v40 }
 0x1cb   :  { %810 = vst.msk [vmem:[#allocation2 + $0xe0] sm:$0xff] %vm246_vm1, %v782_v34 }
 0x1cc   :  { %v1852_v48 = vpop.permute.xlu0 %845 }
 0x1cd   :  { %v672_v58 = vpop.f32.mrf.mxu2 }
 0x1cf   :  { %969 = vrot.lane.b32.xlu2 %v940_v3, %s1197_s5 }
 0x1d0   :  { %973 = vrot.lane.b32.xlu1 %v1799_v14, %s1197_s5 }
 0x1d1   :  { %v524_v55 = vpop.permute.xlu2 %523 }
 0x1d2   :  { %458 = vrot.lane.b32.xlu0 %v1644_v32, %s1198_s2  ;;  %v1859_v57 = vpop.permute.xlu1 %425 }
 0x1d3   :  { %v437_v13 = vsel %vm429_vm5, %v1859_v57, %v428_v43 }
 0x1d4   :  { %v1861_v0 = vpop.permute.xlu0 %885 }
 0x1d7   :  { %975 = vrot.lane.b32.xlu2 %v943_v1, %s1197_s5 }
 0x1d8   :  { %979 = vrot.lane.b32.xlu1 %v1810_v19, %s1197_s5 }
 0x1d9   :  { %v530_v2 = vpop.permute.xlu2 %529 }
 0x1da   :  { %965 = vrot.lane.b32.xlu0 %v938_v42, %s1197_s5  ;;  %v1867_v8 = vpop.permute.xlu1 %466 }
 0x1db   :  { %v478_v32 = vsel %vm470_vm6, %v1867_v8, %v469_v49 }
 0x1dc   :  { %v302_v26 = vpop.permute.xlu0 %301  ;;  %v494_v29 = vsel %vm18_vm7, %v437_v13, %v478_v32 }
 0x1dd   :  { %v1878_v15 = vadd.f32 %v494_v29, %v380_v17 }
 0x1df   :  { %981 = vrot.lane.b32.xlu2 %v946_v41, %s1197_s5 }
 0x1e0   :  { %1001 = vrot.lane.b32.xlu1 %v1759_v61, %s1198_s2  ;;  %v314_v61 = vsel %vm307_vm2, %v302_v26, %v1688_v62 }
 0x1e1   :  { %v233_v43 = vpop.permute.xlu2 %232 }
 0x1e2   :  { %258 = vst.msk [vmem:[#allocation2 + $0x160] sm:$0xff] %vm246_vm1, %v233_v43  ;;  %1005 = vrot.lane.b32.xlu0 %v938_v42, %s1198_s2  ;;  %v1886_v9 = vpop.permute.xlu1 %521  ;;  %v1049_v43 = vld [vmem:[#allocation2 + $0x110] sm:$0xff] }
 0x1e3   :  { %v545_v21 = vsel %vm543_vm9, %v1886_v9, %v524_v55 }
 0x1e4   :  { %v343_v49 = vpop.permute.xlu0 %342  ;;  %v561_v52 = vsel %vm20_vm10, 0.0, %v545_v21 }
 0x1e5   :  { %v355_v27 = vsel %vm348_vm3, %v343_v49, %v1695_v4  ;;  %v577_v30 = vadd.f32 %v1748_v50, %v561_v52 }
 0x1e6   :  { %v1899_v33 = vsel %vm21_vm8, %v314_v61, %v355_v27  ;;  %v1052_v27 = vld [vmem:[#allocation2 + $0x130] sm:$0xff] }
 0x1e7   :  { %1003 = vrot.lane.b32.xlu2 %v937_v38, %s1198_s2  ;;  %585 = vst.msk [vmem:[%s2267_s3 + $0x8] sm:$0xff] %vm174_vm0, %v577_v30  ;;  %v944_v30 = vld [vmem:[#allocation2 + $0xe0] sm:$0xff] }
 0x1e8   :  { %1007 = vrot.lane.b32.xlu1 %v1777_v18, %s1198_s2 }
 0x1e9   :  { %v536_v62 = vpop.permute.xlu2 %535 }
 0x1ea   :  { %423 = vrot.lane.b32.xlu0 %v390_v44, %s1197_s5  ;;  %v231_v4 = vpop.permute.xlu1 %230 }
 0x1eb   :  { %257 = vst.msk [vmem:[#allocation2 + $0x140] sm:$0xff] %vm246_vm1, %v231_v4 }
 0x1ec   :  { %v1910_v50 = vpop.permute.xlu0 %851 }
 0x1ef   :  { %1009 = vrot.lane.b32.xlu2 %v940_v3, %s1198_s2  ;;  %v941_v3 = vld [vmem:[#allocation2 + $0xc0] sm:$0xff] }
 0x1f0   :  { %1013 = vrot.lane.b32.xlu1 %v1799_v14, %s1198_s2  ;;  %v675_v14 = vpop.f32.mrf.mxu2 }
 0x1f1   :  { %v790_v35 = vpop.permute.xlu2 %789 }
 0x1f2   :  { %464 = vrot.lane.b32.xlu0 %v390_v44, %s1198_s2  ;;  %v1916_v38 = vpop.permute.xlu1 %527  ;;  %v501_v61 = vld [vmem:[#allocation2 + $0x140] sm:$0xff] }
 0x1f3   :  { %v547_v18 = vsel %vm543_vm9, %v1916_v38, %v530_v2 }
 0x1f4   :  { %v1920_v40 = vpop.permute.xlu0 %891  ;;  %v563_v34 = vsel %vm20_vm10, 0.0, %v547_v18 }
 0x1f5   :  { %v579_v55 = vadd.f32 %v1795_v12, %v563_v34 }
 0x1f7   :  { %1015 = vrot.lane.b32.xlu2 %v943_v1, %s1198_s2  ;;  %587 = vst.msk [vmem:[%s2267_s3 + $0x18] sm:$0xff] %vm174_vm0, %v579_v55 }
 0x1f8   :  { %1019 = vrot.lane.b32.xlu1 %v1810_v19, %s1198_s2 }
 0x1f9   :  { %v542_v44 = vpop.permute.xlu2 %541 }
 0x1fa   :  { %971 = vrot.lane.b32.xlu0 %v941_v3, %s1197_s5  ;;  %v788_v2 = vpop.permute.xlu1 %787 }
 0x1fb   :  { %813 = vst.msk [vmem:[#allocation2 + $0x140] sm:$0xff] %vm246_vm1, %v788_v2 }
 0x1fc   :  { %v406_v42 = vpop.permute.xlu0 %405 }
 0x1fd   :  { %v430_v17 = vsel %vm429_vm5, %v406_v42, %v1722_v25 }
 0x1ff   :  { %1021 = vrot.lane.b32.xlu2 %v946_v41, %s1198_s2 }
 0x200   :  { %1073 = vrot.lane.b32.xlu1 %v666_v22, %s1199_s6  ;;  %v373_v22 = vsel %vm17_vm11, 0.0, %v1752_v39 }
 0x201   :  { %v884_v12 = vpop.permute.xlu2 %883 }
 0x202   :  { %1011 = vrot.lane.b32.xlu0 %v941_v3, %s1198_s2  ;;  %v1936_v1 = vpop.permute.xlu1 %533  ;;  %v865_v3 = vsel %vm307_vm2, %v1852_v48, %v1677_v54  ;;  %v868_v48 = vsel %vm307_vm2, %v1709_v11, %v1674_v51 }
 0x203   :  { %v549_v19 = vsel %vm543_vm9, %v1936_v1, %v536_v62  ;;  %v863_v62 = vsel %vm307_vm2, %v1791_v10, %v1635_v24 }
 0x204   :  { %v447_v13 = vpop.permute.xlu0 %446  ;;  %v565_v32 = vsel %vm20_vm10, 0.0, %v549_v19  ;;  %v1058_v19 = vld [vmem:[#allocation2 + $0x170] sm:$0xff] }
 0x205   :  { %v471_v26 = vsel %vm470_vm6, %v447_v13, %v1732_v31  ;;  %v581_v29 = vadd.f32 %v1837_v36, %v565_v32 }
 0x206   :  { %v487_v41 = vsel %vm17_vm11, %v430_v17, %v471_v26 }
 0x207   :  { %v1953_v21 = vadd.f32 %v487_v41, %v373_v22  ;;  %1075 = vrot.lane.b32.xlu2 %v1049_v43, %s1199_s6  ;;  %589 = vst.msk [vmem:[%s2267_s3 + $0x28] sm:$0xff] %vm174_vm0, %v581_v29  ;;  %v1047_v41 = vld [vmem:[#allocation2 + $0x100] sm:$0xff] }
 0x208   :  { %1079 = vrot.lane.b32.xlu1 %v669_v7, %s1199_s6 }
 0x209   :  { %v890_v25 = vpop.permute.xlu2 %889 }
 0x20a   :  { %519 = vrot.lane.b32.xlu0 %v1846_v46, %s1199_s6  ;;  %v1963_v31 = vpop.permute.xlu1 %539 }
 0x20b   :  { %v551_v39 = vsel %vm543_vm9, %v1963_v31, %v542_v44  ;;  %v504_v44 = vld [vmem:[#allocation2 + $0x160] sm:$0xff] }
 0x20c   :  { %v858_v36 = vpop.permute.xlu0 %857  ;;  %v567_v49 = vsel %vm20_vm10, 0.0, %v551_v39  ;;  %814 = vst.msk [vmem:[#allocation2 + $0x160] sm:$0xff] %vm246_vm1, %v790_v35 }
 0x20d   :  { %v583_v52 = vadd.f32 %v1878_v15, %v567_v49  ;;  %v864_v15 = vsel %vm307_vm2, %v1635_v24, %v1594_v5  ;;  %v1055_v5 = vld [vmem:[#allocation2 + $0x150] sm:$0xff] }
 0x20f   :  { %1081 = vrot.lane.b32.xlu2 %v1052_v27, %s1199_s6  ;;  %591 = vst.msk [vmem:[%s2267_s3 + $0x38] sm:$0xff] %vm174_vm0, %v583_v52 }
 0x210   :  { %1085 = vrot.lane.b32.xlu1 %v672_v58, %s1199_s6 }
 0x211   :  { %v896_v46 = vpop.permute.xlu2 %895 }
 0x212   :  { %977 = vrot.lane.b32.xlu0 %v944_v30, %s1197_s5  ;;  %v882_v7 = vpop.permute.xlu1 %881 }
 0x213   :  { %v903_v4 = vsel %vm348_vm3, %v1806_v47, %v882_v7  ;;  %v904_v18 = vsel %vm348_vm3, %v882_v7, %v884_v12  ;;  %v866_v47 = vsel %vm307_vm2, %v1677_v54, %v1632_v23 }
 0x214   :  { %v898_v34 = vpop.permute.xlu0 %897  ;;  %v1989_v58 = vsel %vm21_vm8, %v863_v62, %v903_v4  ;;  %v1993_v55 = vsel %vm22_vm4, %v864_v15, %v904_v18 }
 0x217   :  { %1087 = vrot.lane.b32.xlu2 %v1055_v5, %s1199_s6  ;;  %v377_v5 = vsel %vm17_vm11, 0.0, %v1841_v37 }
 0x218   :  { %1091 = vrot.lane.b32.xlu1 %v675_v14, %s1199_s6 }
 0x219   :  { %v902_v24 = vpop.permute.xlu2 %901 }
 0x21a   :  { %1017 = vrot.lane.b32.xlu0 %v944_v30, %s1198_s2  ;;  %v888_v10 = vpop.permute.xlu1 %887 }
 0x21b   :  { %v905_v2 = vsel %vm348_vm3, %v1861_v0, %v888_v10  ;;  %v906_v35 = vsel %vm348_vm3, %v888_v10, %v890_v25  ;;  %v867_v0 = vsel %vm307_vm2, %v1910_v50, %v1709_v11  ;;  %v375_v50 = vsel %vm17_vm11, 0.0, %v1773_v6 }
 0x21c   :  { %v412_v42 = vpop.permute.xlu0 %411  ;;  %v2010_v14 = vsel %vm21_vm8, %v865_v3, %v905_v2  ;;  %v2014_v12 = vsel %vm22_vm4, %v866_v47, %v906_v35  ;;  %v1056_v35 = vld [vmem:[#allocation2 + $0x160] sm:$0xff] }
 0x21d   :  { %v432_v51 = vsel %vm429_vm5, %v412_v42, %v1765_v63  ;;  %v870_v63 = vsel %vm307_vm2, %v1757_v56, %v1715_v16  ;;  %v927_v42 = vsel %vm17_vm11, 0.0, %v1989_v58 }
 0x21f   :  { %1093 = vrot.lane.b32.xlu2 %v1058_v19, %s1199_s6 }
 0x221   :  { %v2017_v23 = vpop.permute.xlu2 %963 }
 0x222   :  { %525 = vrot.lane.b32.xlu0 %v1679_v59, %s1199_s6  ;;  %v894_v54 = vpop.permute.xlu1 %893 }
 0x223   :  { %v907_v13 = vsel %vm348_vm3, %v1920_v40, %v894_v54  ;;  %v908_v32 = vsel %vm348_vm3, %v894_v54, %v896_v46  ;;  %v1050_v46 = vld [vmem:[#allocation2 + $0x120] sm:$0xff] }
 0x224   :  { %v453_v17 = vpop.permute.xlu0 %452  ;;  %v2032_v26 = vsel %vm21_vm8, %v867_v0, %v907_v13  ;;  %v2036_v59 = vsel %vm22_vm4, %v868_v48, %v908_v32 }
 0x225   :  { %v473_v11 = vsel %vm470_vm6, %v453_v17, %v1782_v45  ;;  %v869_v45 = vsel %vm307_vm2, %v858_v36, %v1757_v56  ;;  %v929_v17 = vsel %vm17_vm11, 0.0, %v2010_v14 }
 0x226   :  { %v489_v40 = vsel %vm17_vm11, %v432_v51, %v473_v11 }
 0x227   :  { %v2047_v29 = vadd.f32 %v489_v40, %v375_v50 }
 0x229   :  { %v2049_v22 = vpop.permute.xlu2 %969 }
 0x22a   :  { %1071 = vrot.lane.b32.xlu0 %v1047_v41, %s1199_s6  ;;  %v900_v43 = vpop.permute.xlu1 %899 }
 0x22b   :  { %v909_v6 = vsel %vm348_vm3, %v898_v34, %v900_v43  ;;  %v910_v25 = vsel %vm348_vm3, %v900_v43, %v902_v24 }
 0x22c   :  { %v960_v39 = vpop.permute.xlu0 %959  ;;  %v2061_v49 = vsel %vm21_vm8, %v869_v45, %v909_v6  ;;  %v2065_v52 = vsel %vm22_vm4, %v870_v63, %v910_v25  ;;  %v379_v45 = vsel %vm17_vm11, 0.0, %v1899_v33  ;;  %v928_v33 = vsel %vm18_vm7, 0.0, %v1993_v55 }
 0x231   :  { %v2067_v27 = vpop.permute.xlu2 %975 }
 0x232   :  { %531 = vrot.lane.b32.xlu0 %v501_v61, %s1199_s6  ;;  %v962_v16 = vpop.permute.xlu1 %961 }
 0x233   :  { %v983_v56 = vsel %vm429_vm5, %v960_v39, %v962_v16 }
 0x234   :  { %v1000_v36 = vpop.permute.xlu0 %999 }
 0x239   :  { %v2071_v30 = vpop.permute.xlu2 %981 }
 0x23a   :  { %1077 = vrot.lane.b32.xlu0 %v1050_v46, %s1199_s6  ;;  %v968_v7 = vpop.permute.xlu1 %967 }
 0x23c   :  { %v418_v15 = vpop.permute.xlu0 %417 }
 0x23d   :  { %v434_v61 = vsel %vm429_vm5, %v418_v15, %v1815_v20 }
 0x241   :  { %v1004_v4 = vpop.permute.xlu2 %1003 }
 0x242   :  { %537 = vrot.lane.b32.xlu0 %v504_v44, %s1199_s6  ;;  %v2075_v62 = vpop.permute.xlu1 %973  ;;  %v1053_v44 = vld [vmem:[#allocation2 + $0x140] sm:$0xff] }
 0x244   :  { %v459_v18 = vpop.permute.xlu0 %458 }
 0x245   :  { %v475_v34 = vsel %vm470_vm6, %v459_v18, %v1822_v53 }
 0x246   :  { %v491_v24 = vsel %vm17_vm11, %v434_v61, %v475_v34 }
 0x247   :  { %v2086_v10 = vadd.f32 %v491_v24, %v377_v5  ;;  %v931_v24 = vsel %vm17_vm11, 0.0, %v2032_v26  ;;  %v930_v26 = vsel %vm18_vm7, 0.0, %v2014_v12  ;;  %v988_v12 = vsel %vm429_vm5, %v2075_v62, %v2067_v27 }
 0x249   :  { %v1010_v2 = vpop.permute.xlu2 %1009 }
 0x24a   :  { %1083 = vrot.lane.b32.xlu0 %v1053_v44, %s1199_s6  ;;  %v2089_v47 = vpop.permute.xlu1 %979 }
 0x24c   :  { %v966_v3 = vpop.permute.xlu0 %965 }
 0x24d   :  { %v985_v20 = vsel %vm429_vm5, %v966_v3, %v968_v7  ;;  %v986_v3 = vsel %vm429_vm5, %v968_v7, %v2049_v22 }
 0x251   :  { %v1016_v0 = vpop.permute.xlu2 %1015 }
 0x252   :  { %1089 = vrot.lane.b32.xlu0 %v1056_v35, %s1199_s6  ;;  %v1002_v53 = vpop.permute.xlu1 %1001 }
 0x253   :  { %v1023_v37 = vsel %vm470_vm6, %v1000_v36, %v1002_v53  ;;  %v1024_v36 = vsel %vm470_vm6, %v1002_v53, %v1004_v4 }
 0x254   :  { %v1006_v19 = vpop.permute.xlu0 %1005  ;;  %v1039_v54 = vsel %vm17_vm11, %v983_v56, %v1023_v37 }
 0x255   :  { %v2099_v48 = vadd.f32 %v1039_v54, %v927_v42 }
 0x259   :  { %v1022_v58 = vpop.permute.xlu2 %1021 }
 0x25a   :  { %v1008_v13 = vpop.permute.xlu1 %1007 }
 0x25b   :  { %v1025_v32 = vsel %vm470_vm6, %v1006_v19, %v1008_v13  ;;  %v1026_v5 = vsel %vm470_vm6, %v1008_v13, %v1010_v2 }
 0x25c   :  { %v424_v51 = vpop.permute.xlu0 %423  ;;  %v1041_v11 = vsel %vm17_vm11, %v985_v20, %v1025_v32  ;;  %v1042_v2 = vsel %vm18_vm7, %v986_v3, %v1026_v5 }
 0x25d   :  { %v2107_v50 = vadd.f32 %v1041_v11, %v929_v17  ;;  %v436_v43 = vsel %vm429_vm5, %v424_v51, %v1859_v57  ;;  %v1122_v53 = vadd.f32 %v1042_v2, %v930_v26 }
 0x261   :  { %v1076_v39 = vpop.permute.xlu2 %1075 }
 0x262   :  { %v1014_v40 = vpop.permute.xlu1 %1013 }
 0x263   :  { %v1028_v42 = vsel %vm470_vm6, %v1014_v40, %v1016_v0 }
 0x264   :  { %v465_v41 = vpop.permute.xlu0 %464  ;;  %v1044_v0 = vsel %vm18_vm7, %v988_v12, %v1028_v42 }
 0x265   :  { %v477_v63 = vsel %vm470_vm6, %v465_v41, %v1867_v8  ;;  %v984_v8 = vsel %vm429_vm5, %v962_v16, %v2017_v23 }
 0x266   :  { %v493_v14 = vsel %vm17_vm11, %v436_v43, %v477_v63  ;;  %v1040_v46 = vsel %vm18_vm7, %v984_v8, %v1024_v36  ;;  %v990_v43 = vsel %vm429_vm5, %v2089_v47, %v2071_v30  ;;  %v934_v63 = vsel %vm18_vm7, 0.0, %v2065_v52 }
 0x267   :  { %v2118_v6 = vadd.f32 %v493_v14, %v379_v45  ;;  %v1120_v18 = vadd.f32 %v1040_v46, %v928_v33  ;;  %v933_v46 = vsel %vm17_vm11, 0.0, %v2061_v49 }
 0x269   :  { %v1082_v55 = vpop.permute.xlu2 %1081 }
 0x26a   :  { %v1020_v25 = vpop.permute.xlu1 %1019 }
 0x26c   :  { %v972_v56 = vpop.permute.xlu0 %971 }
 0x26d   :  { %v987_v57 = vsel %vm429_vm5, %v972_v56, %v2075_v62 }
 0x271   :  { %v1088_v17 = vpop.permute.xlu2 %1087 }
 0x272   :  { %v2130_v15 = vpop.permute.xlu1 %1073 }
 0x273   :  { %v1096_v61 = vsel %vm543_vm9, %v2130_v15, %v1076_v39 }
 0x274   :  { %v1012_v4 = vpop.permute.xlu0 %1011  ;;  %v1112_v34 = vsel %vm20_vm10, 0.0, %v1096_v61 }
 0x275   :  { %v1027_v23 = vsel %vm470_vm6, %v1012_v4, %v1014_v40  ;;  %v1128_v16 = vadd.f32 %v1120_v18, %v1112_v34  ;;  %v1030_v40 = vsel %vm470_vm6, %v1020_v25, %v1022_v58 }
 0x276   :  { %v1043_v44 = vsel %vm17_vm11, %v987_v57, %v1027_v23 }
 0x277   :  { %v2145_v20 = vadd.f32 %v1043_v44, %v931_v24  ;;  %1181 = vst.msk [vmem:[%s2267_s3 + $0x48] sm:$0xff] %vm174_vm0, %v1128_v16 }
 0x279   :  { %v1094_v45 = vpop.permute.xlu2 %1093 }
 0x27a   :  { %v1080_v35 = vpop.permute.xlu1 %1079 }
 0x27b   :  { %v1098_v22 = vsel %vm543_vm9, %v1080_v35, %v1082_v55 }
 0x27c   :  { %v520_v7 = vpop.permute.xlu0 %519  ;;  %v1114_v37 = vsel %vm20_vm10, 0.0, %v1098_v22 }
 0x27d   :  { %v544_v19 = vsel %vm543_vm9, %v520_v7, %v1886_v9  ;;  %v1130_v54 = vadd.f32 %v1122_v53, %v1114_v37  ;;  %v932_v9 = vsel %vm18_vm7, 0.0, %v2036_v59  ;;  %v1046_v59 = vsel %vm18_vm7, %v990_v43, %v1030_v40 }
 0x27e   :  { %v560_v13 = vsel %vm19_vm12, 0.0, %v544_v19  ;;  %v1124_v62 = vadd.f32 %v1044_v0, %v932_v9  ;;  %v1126_v58 = vadd.f32 %v1046_v59, %v934_v63 }
 0x27f   :  { %v576_v32 = vadd.f32 %v1953_v21, %v560_v13  ;;  %1183 = vst.msk [vmem:[%s2267_s3 + $0x58] sm:$0xff] %vm174_vm0, %v1130_v54 }
 0x281   :  { %584 = vst [vmem:[%s2267_s3] sm:$0xff] %v576_v32 }
 0x282   :  { %v1086_v27 = vpop.permute.xlu1 %1085 }
 0x283   :  { %v1100_v21 = vsel %vm543_vm9, %v1086_v27, %v1088_v17 }
 0x284   :  { %v978_v51 = vpop.permute.xlu0 %977  ;;  %v1116_v11 = vsel %vm20_vm10, 0.0, %v1100_v21 }
 0x285   :  { %v1132_v41 = vadd.f32 %v1124_v62, %v1116_v11  ;;  %v989_v36 = vsel %vm429_vm5, %v978_v51, %v2089_v47 }
 0x287   :  { %1185 = vst.msk [vmem:[%s2267_s3 + $0x68] sm:$0xff] %vm174_vm0, %v1132_v41 }
 0x28a   :  { %v1092_v14 = vpop.permute.xlu1 %1091 }
 0x28b   :  { %v1102_v39 = vsel %vm543_vm9, %v1092_v14, %v1094_v45 }
 0x28c   :  { %v1018_v56 = vpop.permute.xlu0 %1017  ;;  %v1118_v30 = vsel %vm20_vm10, 0.0, %v1102_v39 }
 0x28d   :  { %v1029_v57 = vsel %vm470_vm6, %v1018_v56, %v1020_v25  ;;  %v1134_v8 = vadd.f32 %v1126_v58, %v1118_v30 }
 0x28e   :  { %v1045_v52 = vsel %vm17_vm11, %v989_v36, %v1029_v57 }
 0x28f   :  { %v1125_v33 = vadd.f32 %v1045_v52, %v933_v46  ;;  %1187 = vst.msk [vmem:[%s2267_s3 + $0x78] sm:$0xff] %vm174_vm0, %v1134_v8 }
 0x294   :  { %v526_v60 = vpop.permute.xlu0 %525 }
 0x295   :  { %v546_v47 = vsel %vm543_vm9, %v526_v60, %v1916_v38 }
 0x296   :  { %v562_v25 = vsel %vm19_vm12, 0.0, %v546_v47 }
 0x297   :  { %v578_v18 = vadd.f32 %v2047_v29, %v562_v25 }
 0x299   :  { %586 = vst [vmem:[%s2267_s3 + $0x10] sm:$0xff] %v578_v18 }
 0x29c   :  { %v1072_v49 = vpop.permute.xlu0 %1071 }
 0x29d   :  { %v1095_v61 = vsel %vm543_vm9, %v1072_v49, %v2130_v15 }
 0x29e   :  { %v1111_v4 = vsel %vm19_vm12, 0.0, %v1095_v61 }
 0x29f   :  { %v1127_v34 = vadd.f32 %v2099_v48, %v1111_v4 }
 0x2a1   :  { %1180 = vst [vmem:[%s2267_s3 + $0x40] sm:$0xff] %v1127_v34 }
 0x2a4   :  { %v532_v38 = vpop.permute.xlu0 %531 }
 0x2a5   :  { %v548_v29 = vsel %vm543_vm9, %v532_v38, %v1936_v1 }
 0x2a6   :  { %v564_v5 = vsel %vm19_vm12, 0.0, %v548_v29 }
 0x2a7   :  { %v580_v23 = vadd.f32 %v2086_v10, %v564_v5 }
 0x2a9   :  { %588 = vst [vmem:[%s2267_s3 + $0x20] sm:$0xff] %v580_v23 }
 0x2ac   :  { %v1078_v15 = vpop.permute.xlu0 %1077 }
 0x2ad   :  { %v1097_v48 = vsel %vm543_vm9, %v1078_v15, %v1080_v35 }
 0x2ae   :  { %v1113_v16 = vsel %vm19_vm12, 0.0, %v1097_v48 }
 0x2af   :  { %v1129_v24 = vadd.f32 %v2107_v50, %v1113_v16 }
 0x2b1   :  { %1182 = vst [vmem:[%s2267_s3 + $0x50] sm:$0xff] %v1129_v24 }
 0x2b4   :  { %v538_v1 = vpop.permute.xlu0 %537 }
 0x2b5   :  { %v550_v10 = vsel %vm543_vm9, %v538_v1, %v1963_v31 }
 0x2b6   :  { %v566_v55 = vsel %vm19_vm12, 0.0, %v550_v10 }
 0x2b7   :  { %v582_v44 = vadd.f32 %v2118_v6, %v566_v55 }
 0x2b9   :  { %590 = vst [vmem:[%s2267_s3 + $0x30] sm:$0xff] %v582_v44 }
 0x2bc   :  { %v1084_v3 = vpop.permute.xlu0 %1083 }
 0x2bd   :  { %v1099_v50 = vsel %vm543_vm9, %v1084_v3, %v1086_v27 }
 0x2be   :  { %v1115_v2 = vsel %vm19_vm12, 0.0, %v1099_v50 }
 0x2bf   :  { %v1131_v26 = vadd.f32 %v2145_v20, %v1115_v2 }
 0x2c1   :  { %1184 = vst [vmem:[%s2267_s3 + $0x60] sm:$0xff] %v1131_v26 }
 0x2c4   :  { %v1090_v31 = vpop.permute.xlu0 %1089 }
 0x2c5   :  { %v1101_v35 = vsel %vm543_vm9, %v1090_v31, %v1092_v14 }
 0x2c6   :  { %v1117_v6 = vsel %vm19_vm12, 0.0, %v1101_v35 }
 0x2c7   :  { %v1133_v53 = vadd.f32 %v1125_v33, %v1117_v6 }
 0x2c9   :  { %1186 = vst [vmem:[%s2267_s3 + $0x70] sm:$0xff] %v1133_v53 }

</bundles_post_ra>
